<compile_context>
chip_gen: v5e
topology: v5e:2x2
jax: 0.10.0
libtpu: 0.0.40
codegen_flags: <defaults>
</compile_context>

<pallas_src>
import functools

import jax
import jax.numpy as jnp
import numpy as np
from jax.experimental import pallas as pl
from jax.experimental.pallas import tpu as pltpu


_MAX_SEQ_TILE_ROWS = 64            # static-unroll bound inside the kernels
_DMA_RING_DEPTH = 16               # max in-flight row DMAs (HBM gather path)
_DEFAULT_VMEM_TABLE_BYTES = 4 * 1024 * 1024   # resident-table threshold


# ---------------------------------------------------------------------------
# Kernels
# ---------------------------------------------------------------------------

def _vmem_gather_kernel(tok_smem, learned_ref, wte_ref, out_ref, *,
                        n_eff: int, seq_len: int, seq_tile: int):
    """Small-table fast path: table resident in VMEM, rows gathered with
    dynamic slices straight into the (TS, D) output block.

    tok_smem    : (B*S,)   int32 SMEM (scalar prefetch)
    learned_ref : (NT, D)  VMEM (resident, constant index_map)
    wte_ref     : (V, D)   VMEM (resident, constant index_map)
    out_ref     : (TS, D)  VMEM output block for (batch b, seq tile st)
    """
    b = pl.program_id(0)
    st = pl.program_id(1)
    base = st * seq_tile

    # 1) Gather every row of this tile from the resident table.
    for i in range(seq_tile):
        tok = tok_smem[b * seq_len + base + i]
        out_ref[pl.ds(i, 1), :] = wte_ref[pl.ds(tok, 1), :]

    # 2) Overwrite the learned soft-prompt prefix rows (global position < n_eff;
    #    statically only the first min(TS, n_eff) rows of a tile can qualify).
    for i in range(min(seq_tile, n_eff)):
        s = base + i

        @pl.when(s < n_eff)
        def _(i=i, s=s):
            out_ref[pl.ds(i, 1), :] = learned_ref[pl.ds(s, 1), :]


def _hbm_gather_kernel(tok_smem, learned_ref, wte_hbm, out_ref, sems, *,
                       n_eff: int, seq_len: int, seq_tile: int, n_sems: int):
    """Large-table path: per-row HBM->VMEM DMAs directly into the output
    block, bounded by a small semaphore ring (no staging tile).

    tok_smem    : (B*S,)   int32 SMEM (scalar prefetch)
    learned_ref : (NT, D)  VMEM (resident)
    wte_hbm     : (V, D)   HBM (memory_space=pl.ANY, manual DMA gather)
    out_ref     : (TS, D)  VMEM output block for (batch b, seq tile st)
    sems        : (n_sems,) DMA semaphores (ring)
    """
    b = pl.program_id(0)
    st = pl.program_id(1)
    base = st * seq_tile

    def start_row(i):
        tok = tok_smem[b * seq_len + base + i]
        pltpu.make_async_copy(
            wte_hbm.at[pl.ds(tok, 1), :],       # (1, D) table row (HBM)
            out_ref.at[pl.ds(i, 1), :],         # straight into the output block
            sems.at[i % n_sems]).start()

    def wait_row(i):
        # Matching-size descriptor on the same destination / semaphore slot.
        pltpu.make_async_copy(
            wte_hbm.at[pl.ds(0, 1), :],
            out_ref.at[pl.ds(i, 1), :],
            sems.at[i % n_sems]).wait()

    # 1) Issue row DMAs; at most n_sems concurrently in flight.  Prefix rows
    #    are fetched too (valid ids) and overwritten below — keeps the DMA
    #    accounting unconditional (no conditional start/wait mismatch).
    for i in range(seq_tile):
        if i >= n_sems:
            wait_row(i - n_sems)
        start_row(i)

    # 2) Drain the outstanding tail.
    for i in range(max(0, seq_tile - n_sems), seq_tile):
        wait_row(i)

    # 3) Learned soft-prompt prefix rows (after all DMAs have landed).
    for i in range(min(seq_tile, n_eff)):
        s = base + i

        @pl.when(s < n_eff)
        def _(i=i, s=s):
            out_ref[pl.ds(i, 1), :] = learned_ref[pl.ds(s, 1), :]


# ---------------------------------------------------------------------------
# Wrapper
# ---------------------------------------------------------------------------

def _choose_seq_tile(seq_len: int, hidden: int, itemsize: int) -> int:
    """Largest tile that divides S, is a multiple of 8 (sublane) or equals S,
    keeps the double-buffered output block ~<= 2 MiB, and bounds the static
    unroll inside the kernel."""
    row_bytes = hidden * itemsize
    budget_rows = max(8, (1 << 20) // max(1, row_bytes))   # ~1 MiB per block
    cap = min(_MAX_SEQ_TILE_ROWS, budget_rows)
    if seq_len <= cap:
        return seq_len
    best = 0
    t = 8
    while t <= cap:
        if seq_len % t == 0:
            best = t
        t += 8
    # TODO(synk): if S has no multiple-of-8 divisor <= cap, fall back to one
    # full-S block (rare; vmem_limit_bytes below still budgets for it).
    return best if best > 0 else seq_len


def soft_embedding_forward(tokens, wte_weight, learned_embedding, n_tokens, *,
                           seq_tile=None,
                           vmem_table_bytes_max=_DEFAULT_VMEM_TABLE_BYTES):
    """JAX/Pallas equivalent of SoftEmbedding.forward."""
    B, S = tokens.shape
    V, D = wte_weight.shape
    NT, D2 = learned_embedding.shape
    assert NT == n_tokens and D2 == D
    assert D % 128 == 0, "hidden dim must be a multiple of 128 (lane width)"
    assert learned_embedding.dtype == wte_weight.dtype, (
        "learned_embedding dtype must match the embedding table dtype")
    # PyTorch module implicitly assumes S > n_tokens whenever S > 1.
    assert S == 1 or S > n_tokens, "SoftEmbedding requires S == 1 or S > n_tokens"

    n_eff = n_tokens if S > 1 else 0
    itemsize = jnp.dtype(wte_weight.dtype).itemsize

    if seq_tile is None:
        seq_tile = _choose_seq_tile(S, D, itemsize)
    assert S % seq_tile == 0 and (seq_tile % 8 == 0 or seq_tile == S), (
        "seq_tile must divide S and be a multiple of 8 (or equal S)")
    n_seq_tiles = S // seq_tile

    # 1-D int32 token ids for the SMEM scalar prefetch, clamped so an invalid
    # id can never address outside the table (semantic deviation documented).
    tok_flat = jnp.clip(tokens.reshape(-1).astype(jnp.int32), 0, V - 1)

    table_bytes = V * D * itemsize
    use_vmem_table = table_bytes <= vmem_table_bytes_max

    # Explicit VMEM budget: double-buffered output block + resident inputs.
    out_block_bytes = seq_tile * D * itemsize
    vmem_need = (2 * out_block_bytes + 2 * NT * D * itemsize
                 + (2 * table_bytes if use_vmem_table else 0))
    vmem_limit = int(min(max(16 << 20, 2 * vmem_need + (2 << 20)), 64 << 20))

    learned_spec = pl.BlockSpec((NT, D), lambda b, st, tok: (0, 0))
    out_spec = pl.BlockSpec((None, seq_tile, D), lambda b, st, tok: (b, st, 0))

    if use_vmem_table:
        kernel = functools.partial(_vmem_gather_kernel, n_eff=n_eff,
                                   seq_len=S, seq_tile=seq_tile)
        in_specs = [learned_spec,
                    pl.BlockSpec((V, D), lambda b, st, tok: (0, 0))]
        scratch_shapes = []
    else:
        n_sems = min(_DMA_RING_DEPTH, seq_tile)
        kernel = functools.partial(_hbm_gather_kernel, n_eff=n_eff,
                                   seq_len=S, seq_tile=seq_tile, n_sems=n_sems)
        in_specs = [learned_spec, pl.BlockSpec(memory_space=pl.ANY)]
        scratch_shapes = [pltpu.SemaphoreType.DMA((n_sems,))]

    return pl.pallas_call(
        kernel,
        out_shape=jax.ShapeDtypeStruct((B, S, D), wte_weight.dtype),
        grid_spec=pltpu.PrefetchScalarGridSpec(
            num_scalar_prefetch=1,              # tok_flat -> SMEM
            grid=(B, n_seq_tiles),
            in_specs=in_specs,
            out_specs=out_spec,
            scratch_shapes=scratch_shapes,
        ),
        compiler_params=pltpu.CompilerParams(
            dimension_semantics=("parallel", "parallel"),
            vmem_limit_bytes=vmem_limit),
    )(tok_flat, learned_embedding, wte_weight)


# ---------------------------------------------------------------------------
# Reference + self-test
# ---------------------------------------------------------------------------

def _reference_forward(tokens, wte_weight, learned_embedding, n_tokens):
    """Pure-JAX reference mirroring the PyTorch forward."""
    B, S = tokens.shape
    if S > 1:
        input_embedding = wte_weight[tokens[:, n_tokens:]]           # (B, S-nt, D)
        learned = jnp.broadcast_to(learned_embedding[None],
                                   (B,) + learned_embedding.shape)   # (B, nt, D)
        return jnp.concatenate([learned, input_embedding], axis=1)   # (B, S, D)
    return wte_weight[tokens]                                        # (B, 1, D)


if __name__ == "__main__":
    # Small, deterministic synthetic setup.
    B, S = 2, 16         # batch, sequence length (S > n_tokens)
    V, D = 32, 128       # vocab size, hidden dim (D lane-aligned)
    N_TOKENS = 4         # number of learned soft tokens

    key = jax.random.PRNGKey(0)
    k_wte, k_tok = jax.random.split(key)

    wte_weight = jax.random.normal(k_wte, (V, D), dtype=jnp.float32) * 0.02
    learned_embedding = wte_weight[:N_TOKENS]     # initialize_from_vocab=True
    tokens = jax.random.randint(k_tok, (B, S), 0, V, dtype=jnp.int32)

    ref = _reference_forward(tokens, wte_weight, learned_embedding, N_TOKENS)

    # 1) Small-table fast path: table resident in VMEM, auto tile selection.
    out = jax.block_until_ready(
        soft_embedding_forward(tokens, wte_weight, learned_embedding, N_TOKENS))
    np.testing.assert_allclose(np.asarray(out), np.asarray(ref), atol=1e-6)

    # 2) Large-table path (forced): HBM row-DMA gather straight into the
    #    output block, with sequence tiling (grid = (B, 2)).
    out_hbm = jax.block_until_ready(
        soft_embedding_forward(tokens, wte_weight, learned_embedding, N_TOKENS,
                               seq_tile=8, vmem_table_bytes_max=0))
    np.testing.assert_allclose(np.asarray(out_hbm), np.asarray(ref), atol=1e-6)

    # 3) S == 1 branch (plain wte lookup, no learned prefix), both paths.
    tokens1 = tokens[:, :1]
    ref1 = _reference_forward(tokens1, wte_weight, learned_embedding, N_TOKENS)
    out1 = jax.block_until_ready(
        soft_embedding_forward(tokens1, wte_weight, learned_embedding, N_TOKENS))
    np.testing.assert_allclose(np.asarray(out1), np.asarray(ref1), atol=1e-6)
    out1h = jax.block_until_ready(
        soft_embedding_forward(tokens1, wte_weight, learned_embedding, N_TOKENS,
                               vmem_table_bytes_max=0))
    np.testing.assert_allclose(np.asarray(out1h), np.asarray(ref1), atol=1e-6)

    print("KERNEL_OK")
</pallas_src>

<mosaic_0001>
module attributes {stable_mosaic.version = 11 : i64} {
  func.func @_vmem_gather_kernel(%arg0: i32, %arg1: i32, %arg2: memref<32xi32, #tpu.memory_space<smem>>, %arg3: memref<4x128xf32, #tpu.memory_space<vmem>>, %arg4: memref<32x128xf32, #tpu.memory_space<vmem>>, %arg5: memref<1x16x128xf32, #tpu.memory_space<vmem>>) attributes {dimension_semantics = [#tpu.dimension_semantics<parallel>, #tpu.dimension_semantics<parallel>], iteration_bounds = array<i64: 2, 1>, scalar_prefetch = 1 : i64, scratch_operands = 0 : i64, tpu.core_type = #tpu.core_type<tc>, window_params = [{pipeline_mode = #tpu.pipeline_mode<synchronous>, transform_indices = @transform_0, window_bounds = array<i64: 4, 128>}, {pipeline_mode = #tpu.pipeline_mode<synchronous>, transform_indices = @transform_1, window_bounds = array<i64: 32, 128>}, {transform_indices = @transform_2, window_bounds = array<i64: 1, 16, 128>}]} {
    %c16_i32 = arith.constant 16 : i32
    %0 = arith.muli %arg1, %c16_i32 : i32
    %c16_i32_0 = arith.constant 16 : i32
    %1 = arith.muli %arg0, %c16_i32_0 : i32
    %2 = arith.addi %1, %0 : i32
    %c0_i32 = arith.constant 0 : i32
    %3 = arith.addi %2, %c0_i32 : i32
    %4 = arith.index_cast %3 : i32 to index
    %5 = memref.load %arg2[%4] : memref<32xi32, #tpu.memory_space<smem>>
    %6 = arith.index_cast %5 : i32 to index
    %c0 = arith.constant 0 : index
    %7 = vector.load %arg4[%6, %c0] : memref<32x128xf32, #tpu.memory_space<vmem>>, vector<1x128xf32>
    %c0_1 = arith.constant 0 : index
    %c0_2 = arith.constant 0 : index
    %c0_3 = arith.constant 0 : index
    %8 = vector.load %arg5[%c0_1, %c0_2, %c0_3] : memref<1x16x128xf32, #tpu.memory_space<vmem>>, vector<1x1x128xf32>
    %9 = vector.shape_cast %8 : vector<1x1x128xf32> to vector<1x128xf32>
    %10 = vector.shape_cast %7 : vector<1x128xf32> to vector<1x1x128xf32>
    tpu.vector_store %arg5[%c0_1, %c0_2, %c0_3], %10 {strides = array<i32>} : memref<1x16x128xf32, #tpu.memory_space<vmem>>, vector<1x1x128xf32>,
    %c16_i32_4 = arith.constant 16 : i32
    %11 = arith.muli %arg0, %c16_i32_4 : i32
    %12 = arith.addi %11, %0 : i32
    %c1_i32 = arith.constant 1 : i32
    %13 = arith.addi %12, %c1_i32 : i32
    %14 = arith.index_cast %13 : i32 to index
    %15 = memref.load %arg2[%14] : memref<32xi32, #tpu.memory_space<smem>>
    %16 = arith.index_cast %15 : i32 to index
    %c0_5 = arith.constant 0 : index
    %17 = vector.load %arg4[%16, %c0_5] : memref<32x128xf32, #tpu.memory_space<vmem>>, vector<1x128xf32>
    %c0_6 = arith.constant 0 : index
    %c1 = arith.constant 1 : index
    %c0_7 = arith.constant 0 : index
    %18 = vector.load %arg5[%c0_6, %c1, %c0_7] : memref<1x16x128xf32, #tpu.memory_space<vmem>>, vector<1x1x128xf32>
    %19 = vector.shape_cast %18 : vector<1x1x128xf32> to vector<1x128xf32>
    %20 = vector.shape_cast %17 : vector<1x128xf32> to vector<1x1x128xf32>
    tpu.vector_store %arg5[%c0_6, %c1, %c0_7], %20 {strides = array<i32>} : memref<1x16x128xf32, #tpu.memory_space<vmem>>, vector<1x1x128xf32>,
    %c16_i32_8 = arith.constant 16 : i32
    %21 = arith.muli %arg0, %c16_i32_8 : i32
    %22 = arith.addi %21, %0 : i32
    %c2_i32 = arith.constant 2 : i32
    %23 = arith.addi %22, %c2_i32 : i32
    %24 = arith.index_cast %23 : i32 to index
    %25 = memref.load %arg2[%24] : memref<32xi32, #tpu.memory_space<smem>>
    %26 = arith.index_cast %25 : i32 to index
    %c0_9 = arith.constant 0 : index
    %27 = vector.load %arg4[%26, %c0_9] : memref<32x128xf32, #tpu.memory_space<vmem>>, vector<1x128xf32>
    %c0_10 = arith.constant 0 : index
    %c2 = arith.constant 2 : index
    %c0_11 = arith.constant 0 : index
    %28 = vector.load %arg5[%c0_10, %c2, %c0_11] : memref<1x16x128xf32, #tpu.memory_space<vmem>>, vector<1x1x128xf32>
    %29 = vector.shape_cast %28 : vector<1x1x128xf32> to vector<1x128xf32>
    %30 = vector.shape_cast %27 : vector<1x128xf32> to vector<1x1x128xf32>
    tpu.vector_store %arg5[%c0_10, %c2, %c0_11], %30 {strides = array<i32>} : memref<1x16x128xf32, #tpu.memory_space<vmem>>, vector<1x1x128xf32>,
    %c16_i32_12 = arith.constant 16 : i32
    %31 = arith.muli %arg0, %c16_i32_12 : i32
    %32 = arith.addi %31, %0 : i32
    %c3_i32 = arith.constant 3 : i32
    %33 = arith.addi %32, %c3_i32 : i32
    %34 = arith.index_cast %33 : i32 to index
    %35 = memref.load %arg2[%34] : memref<32xi32, #tpu.memory_space<smem>>
    %36 = arith.index_cast %35 : i32 to index
    %c0_13 = arith.constant 0 : index
    %37 = vector.load %arg4[%36, %c0_13] : memref<32x128xf32, #tpu.memory_space<vmem>>, vector<1x128xf32>
    %c0_14 = arith.constant 0 : index
    %c3 = arith.constant 3 : index
    %c0_15 = arith.constant 0 : index
    %38 = vector.load %arg5[%c0_14, %c3, %c0_15] : memref<1x16x128xf32, #tpu.memory_space<vmem>>, vector<1x1x128xf32>
    %39 = vector.shape_cast %38 : vector<1x1x128xf32> to vector<1x128xf32>
    %40 = vector.shape_cast %37 : vector<1x128xf32> to vector<1x1x128xf32>
    tpu.vector_store %arg5[%c0_14, %c3, %c0_15], %40 {strides = array<i32>} : memref<1x16x128xf32, #tpu.memory_space<vmem>>, vector<1x1x128xf32>,
    %c16_i32_16 = arith.constant 16 : i32
    %41 = arith.muli %arg0, %c16_i32_16 : i32
    %42 = arith.addi %41, %0 : i32
    %c4_i32 = arith.constant 4 : i32
    %43 = arith.addi %42, %c4_i32 : i32
    %44 = arith.index_cast %43 : i32 to index
    %45 = memref.load %arg2[%44] : memref<32xi32, #tpu.memory_space<smem>>
    %46 = arith.index_cast %45 : i32 to index
    %c0_17 = arith.constant 0 : index
    %47 = vector.load %arg4[%46, %c0_17] : memref<32x128xf32, #tpu.memory_space<vmem>>, vector<1x128xf32>
    %c0_18 = arith.constant 0 : index
    %c4 = arith.constant 4 : index
    %c0_19 = arith.constant 0 : index
    %48 = vector.load %arg5[%c0_18, %c4, %c0_19] : memref<1x16x128xf32, #tpu.memory_space<vmem>>, vector<1x1x128xf32>
    %49 = vector.shape_cast %48 : vector<1x1x128xf32> to vector<1x128xf32>
    %50 = vector.shape_cast %47 : vector<1x128xf32> to vector<1x1x128xf32>
    tpu.vector_store %arg5[%c0_18, %c4, %c0_19], %50 {strides = array<i32>} : memref<1x16x128xf32, #tpu.memory_space<vmem>>, vector<1x1x128xf32>,
    %c16_i32_20 = arith.constant 16 : i32
    %51 = arith.muli %arg0, %c16_i32_20 : i32
    %52 = arith.addi %51, %0 : i32
    %c5_i32 = arith.constant 5 : i32
    %53 = arith.addi %52, %c5_i32 : i32
    %54 = arith.index_cast %53 : i32 to index
    %55 = memref.load %arg2[%54] : memref<32xi32, #tpu.memory_space<smem>>
    %56 = arith.index_cast %55 : i32 to index
    %c0_21 = arith.constant 0 : index
    %57 = vector.load %arg4[%56, %c0_21] : memref<32x128xf32, #tpu.memory_space<vmem>>, vector<1x128xf32>
    %c0_22 = arith.constant 0 : index
    %c5 = arith.constant 5 : index
    %c0_23 = arith.constant 0 : index
    %58 = vector.load %arg5[%c0_22, %c5, %c0_23] : memref<1x16x128xf32, #tpu.memory_space<vmem>>, vector<1x1x128xf32>
    %59 = vector.shape_cast %58 : vector<1x1x128xf32> to vector<1x128xf32>
    %60 = vector.shape_cast %57 : vector<1x128xf32> to vector<1x1x128xf32>
    tpu.vector_store %arg5[%c0_22, %c5, %c0_23], %60 {strides = array<i32>} : memref<1x16x128xf32, #tpu.memory_space<vmem>>, vector<1x1x128xf32>,
    %c16_i32_24 = arith.constant 16 : i32
    %61 = arith.muli %arg0, %c16_i32_24 : i32
    %62 = arith.addi %61, %0 : i32
    %c6_i32 = arith.constant 6 : i32
    %63 = arith.addi %62, %c6_i32 : i32
    %64 = arith.index_cast %63 : i32 to index
    %65 = memref.load %arg2[%64] : memref<32xi32, #tpu.memory_space<smem>>
    %66 = arith.index_cast %65 : i32 to index
    %c0_25 = arith.constant 0 : index
    %67 = vector.load %arg4[%66, %c0_25] : memref<32x128xf32, #tpu.memory_space<vmem>>, vector<1x128xf32>
    %c0_26 = arith.constant 0 : index
    %c6 = arith.constant 6 : index
    %c0_27 = arith.constant 0 : index
    %68 = vector.load %arg5[%c0_26, %c6, %c0_27] : memref<1x16x128xf32, #tpu.memory_space<vmem>>, vector<1x1x128xf32>
    %69 = vector.shape_cast %68 : vector<1x1x128xf32> to vector<1x128xf32>
    %70 = vector.shape_cast %67 : vector<1x128xf32> to vector<1x1x128xf32>
    tpu.vector_store %arg5[%c0_26, %c6, %c0_27], %70 {strides = array<i32>} : memref<1x16x128xf32, #tpu.memory_space<vmem>>, vector<1x1x128xf32>,
    %c16_i32_28 = arith.constant 16 : i32
    %71 = arith.muli %arg0, %c16_i32_28 : i32
    %72 = arith.addi %71, %0 : i32
    %c7_i32 = arith.constant 7 : i32
    %73 = arith.addi %72, %c7_i32 : i32
    %74 = arith.index_cast %73 : i32 to index
    %75 = memref.load %arg2[%74] : memref<32xi32, #tpu.memory_space<smem>>
    %76 = arith.index_cast %75 : i32 to index
    %c0_29 = arith.constant 0 : index
    %77 = vector.load %arg4[%76, %c0_29] : memref<32x128xf32, #tpu.memory_space<vmem>>, vector<1x128xf32>
    %c0_30 = arith.constant 0 : index
    %c7 = arith.constant 7 : index
    %c0_31 = arith.constant 0 : index
    %78 = vector.load %arg5[%c0_30, %c7, %c0_31] : memref<1x16x128xf32, #tpu.memory_space<vmem>>, vector<1x1x128xf32>
    %79 = vector.shape_cast %78 : vector<1x1x128xf32> to vector<1x128xf32>
    %80 = vector.shape_cast %77 : vector<1x128xf32> to vector<1x1x128xf32>
    tpu.vector_store %arg5[%c0_30, %c7, %c0_31], %80 {strides = array<i32>} : memref<1x16x128xf32, #tpu.memory_space<vmem>>, vector<1x1x128xf32>,
    %c16_i32_32 = arith.constant 16 : i32
    %81 = arith.muli %arg0, %c16_i32_32 : i32
    %82 = arith.addi %81, %0 : i32
    %c8_i32 = arith.constant 8 : i32
    %83 = arith.addi %82, %c8_i32 : i32
    %84 = arith.index_cast %83 : i32 to index
    %85 = memref.load %arg2[%84] : memref<32xi32, #tpu.memory_space<smem>>
    %86 = arith.index_cast %85 : i32 to index
    %c0_33 = arith.constant 0 : index
    %87 = vector.load %arg4[%86, %c0_33] : memref<32x128xf32, #tpu.memory_space<vmem>>, vector<1x128xf32>
    %c0_34 = arith.constant 0 : index
    %c8 = arith.constant 8 : index
    %c0_35 = arith.constant 0 : index
    %88 = vector.load %arg5[%c0_34, %c8, %c0_35] : memref<1x16x128xf32, #tpu.memory_space<vmem>>, vector<1x1x128xf32>
    %89 = vector.shape_cast %88 : vector<1x1x128xf32> to vector<1x128xf32>
    %90 = vector.shape_cast %87 : vector<1x128xf32> to vector<1x1x128xf32>
    tpu.vector_store %arg5[%c0_34, %c8, %c0_35], %90 {strides = array<i32>} : memref<1x16x128xf32, #tpu.memory_space<vmem>>, vector<1x1x128xf32>,
    %c16_i32_36 = arith.constant 16 : i32
    %91 = arith.muli %arg0, %c16_i32_36 : i32
    %92 = arith.addi %91, %0 : i32
    %c9_i32 = arith.constant 9 : i32
    %93 = arith.addi %92, %c9_i32 : i32
    %94 = arith.index_cast %93 : i32 to index
    %95 = memref.load %arg2[%94] : memref<32xi32, #tpu.memory_space<smem>>
    %96 = arith.index_cast %95 : i32 to index
    %c0_37 = arith.constant 0 : index
    %97 = vector.load %arg4[%96, %c0_37] : memref<32x128xf32, #tpu.memory_space<vmem>>, vector<1x128xf32>
    %c0_38 = arith.constant 0 : index
    %c9 = arith.constant 9 : index
    %c0_39 = arith.constant 0 : index
    %98 = vector.load %arg5[%c0_38, %c9, %c0_39] : memref<1x16x128xf32, #tpu.memory_space<vmem>>, vector<1x1x128xf32>
    %99 = vector.shape_cast %98 : vector<1x1x128xf32> to vector<1x128xf32>
    %100 = vector.shape_cast %97 : vector<1x128xf32> to vector<1x1x128xf32>
    tpu.vector_store %arg5[%c0_38, %c9, %c0_39], %100 {strides = array<i32>} : memref<1x16x128xf32, #tpu.memory_space<vmem>>, vector<1x1x128xf32>,
    %c16_i32_40 = arith.constant 16 : i32
    %101 = arith.muli %arg0, %c16_i32_40 : i32
    %102 = arith.addi %101, %0 : i32
    %c10_i32 = arith.constant 10 : i32
    %103 = arith.addi %102, %c10_i32 : i32
    %104 = arith.index_cast %103 : i32 to index
    %105 = memref.load %arg2[%104] : memref<32xi32, #tpu.memory_space<smem>>
    %106 = arith.index_cast %105 : i32 to index
    %c0_41 = arith.constant 0 : index
    %107 = vector.load %arg4[%106, %c0_41] : memref<32x128xf32, #tpu.memory_space<vmem>>, vector<1x128xf32>
    %c0_42 = arith.constant 0 : index
    %c10 = arith.constant 10 : index
    %c0_43 = arith.constant 0 : index
    %108 = vector.load %arg5[%c0_42, %c10, %c0_43] : memref<1x16x128xf32, #tpu.memory_space<vmem>>, vector<1x1x128xf32>
    %109 = vector.shape_cast %108 : vector<1x1x128xf32> to vector<1x128xf32>
    %110 = vector.shape_cast %107 : vector<1x128xf32> to vector<1x1x128xf32>
    tpu.vector_store %arg5[%c0_42, %c10, %c0_43], %110 {strides = array<i32>} : memref<1x16x128xf32, #tpu.memory_space<vmem>>, vector<1x1x128xf32>,
    %c16_i32_44 = arith.constant 16 : i32
    %111 = arith.muli %arg0, %c16_i32_44 : i32
    %112 = arith.addi %111, %0 : i32
    %c11_i32 = arith.constant 11 : i32
    %113 = arith.addi %112, %c11_i32 : i32
    %114 = arith.index_cast %113 : i32 to index
    %115 = memref.load %arg2[%114] : memref<32xi32, #tpu.memory_space<smem>>
    %116 = arith.index_cast %115 : i32 to index
    %c0_45 = arith.constant 0 : index
    %117 = vector.load %arg4[%116, %c0_45] : memref<32x128xf32, #tpu.memory_space<vmem>>, vector<1x128xf32>
    %c0_46 = arith.constant 0 : index
    %c11 = arith.constant 11 : index
    %c0_47 = arith.constant 0 : index
    %118 = vector.load %arg5[%c0_46, %c11, %c0_47] : memref<1x16x128xf32, #tpu.memory_space<vmem>>, vector<1x1x128xf32>
    %119 = vector.shape_cast %118 : vector<1x1x128xf32> to vector<1x128xf32>
    %120 = vector.shape_cast %117 : vector<1x128xf32> to vector<1x1x128xf32>
    tpu.vector_store %arg5[%c0_46, %c11, %c0_47], %120 {strides = array<i32>} : memref<1x16x128xf32, #tpu.memory_space<vmem>>, vector<1x1x128xf32>,
    %c16_i32_48 = arith.constant 16 : i32
    %121 = arith.muli %arg0, %c16_i32_48 : i32
    %122 = arith.addi %121, %0 : i32
    %c12_i32 = arith.constant 12 : i32
    %123 = arith.addi %122, %c12_i32 : i32
    %124 = arith.index_cast %123 : i32 to index
    %125 = memref.load %arg2[%124] : memref<32xi32, #tpu.memory_space<smem>>
    %126 = arith.index_cast %125 : i32 to index
    %c0_49 = arith.constant 0 : index
    %127 = vector.load %arg4[%126, %c0_49] : memref<32x128xf32, #tpu.memory_space<vmem>>, vector<1x128xf32>
    %c0_50 = arith.constant 0 : index
    %c12 = arith.constant 12 : index
    %c0_51 = arith.constant 0 : index
    %128 = vector.load %arg5[%c0_50, %c12, %c0_51] : memref<1x16x128xf32, #tpu.memory_space<vmem>>, vector<1x1x128xf32>
    %129 = vector.shape_cast %128 : vector<1x1x128xf32> to vector<1x128xf32>
    %130 = vector.shape_cast %127 : vector<1x128xf32> to vector<1x1x128xf32>
    tpu.vector_store %arg5[%c0_50, %c12, %c0_51], %130 {strides = array<i32>} : memref<1x16x128xf32, #tpu.memory_space<vmem>>, vector<1x1x128xf32>,
    %c16_i32_52 = arith.constant 16 : i32
    %131 = arith.muli %arg0, %c16_i32_52 : i32
    %132 = arith.addi %131, %0 : i32
    %c13_i32 = arith.constant 13 : i32
    %133 = arith.addi %132, %c13_i32 : i32
    %134 = arith.index_cast %133 : i32 to index
    %135 = memref.load %arg2[%134] : memref<32xi32, #tpu.memory_space<smem>>
    %136 = arith.index_cast %135 : i32 to index
    %c0_53 = arith.constant 0 : index
    %137 = vector.load %arg4[%136, %c0_53] : memref<32x128xf32, #tpu.memory_space<vmem>>, vector<1x128xf32>
    %c0_54 = arith.constant 0 : index
    %c13 = arith.constant 13 : index
    %c0_55 = arith.constant 0 : index
    %138 = vector.load %arg5[%c0_54, %c13, %c0_55] : memref<1x16x128xf32, #tpu.memory_space<vmem>>, vector<1x1x128xf32>
    %139 = vector.shape_cast %138 : vector<1x1x128xf32> to vector<1x128xf32>
    %140 = vector.shape_cast %137 : vector<1x128xf32> to vector<1x1x128xf32>
    tpu.vector_store %arg5[%c0_54, %c13, %c0_55], %140 {strides = array<i32>} : memref<1x16x128xf32, #tpu.memory_space<vmem>>, vector<1x1x128xf32>,
    %c16_i32_56 = arith.constant 16 : i32
    %141 = arith.muli %arg0, %c16_i32_56 : i32
    %142 = arith.addi %141, %0 : i32
    %c14_i32 = arith.constant 14 : i32
    %143 = arith.addi %142, %c14_i32 : i32
    %144 = arith.index_cast %143 : i32 to index
    %145 = memref.load %arg2[%144] : memref<32xi32, #tpu.memory_space<smem>>
    %146 = arith.index_cast %145 : i32 to index
    %c0_57 = arith.constant 0 : index
    %147 = vector.load %arg4[%146, %c0_57] : memref<32x128xf32, #tpu.memory_space<vmem>>, vector<1x128xf32>
    %c0_58 = arith.constant 0 : index
    %c14 = arith.constant 14 : index
    %c0_59 = arith.constant 0 : index
    %148 = vector.load %arg5[%c0_58, %c14, %c0_59] : memref<1x16x128xf32, #tpu.memory_space<vmem>>, vector<1x1x128xf32>
    %149 = vector.shape_cast %148 : vector<1x1x128xf32> to vector<1x128xf32>
    %150 = vector.shape_cast %147 : vector<1x128xf32> to vector<1x1x128xf32>
    tpu.vector_store %arg5[%c0_58, %c14, %c0_59], %150 {strides = array<i32>} : memref<1x16x128xf32, #tpu.memory_space<vmem>>, vector<1x1x128xf32>,
    %c16_i32_60 = arith.constant 16 : i32
    %151 = arith.muli %arg0, %c16_i32_60 : i32
    %152 = arith.addi %151, %0 : i32
    %c15_i32 = arith.constant 15 : i32
    %153 = arith.addi %152, %c15_i32 : i32
    %154 = arith.index_cast %153 : i32 to index
    %155 = memref.load %arg2[%154] : memref<32xi32, #tpu.memory_space<smem>>
    %156 = arith.index_cast %155 : i32 to index
    %c0_61 = arith.constant 0 : index
    %157 = vector.load %arg4[%156, %c0_61] : memref<32x128xf32, #tpu.memory_space<vmem>>, vector<1x128xf32>
    %c0_62 = arith.constant 0 : index
    %c15 = arith.constant 15 : index
    %c0_63 = arith.constant 0 : index
    %158 = vector.load %arg5[%c0_62, %c15, %c0_63] : memref<1x16x128xf32, #tpu.memory_space<vmem>>, vector<1x1x128xf32>
    %159 = vector.shape_cast %158 : vector<1x1x128xf32> to vector<1x128xf32>
    %160 = vector.shape_cast %157 : vector<1x128xf32> to vector<1x1x128xf32>
    tpu.vector_store %arg5[%c0_62, %c15, %c0_63], %160 {strides = array<i32>} : memref<1x16x128xf32, #tpu.memory_space<vmem>>, vector<1x1x128xf32>,
    %c0_i32_64 = arith.constant 0 : i32
    %161 = arith.addi %0, %c0_i32_64 : i32
    %c4_i32_65 = arith.constant 4 : i32
    %162 = arith.cmpi slt, %161, %c4_i32_65 : i32
    %163 = arith.extui %162 : i1 to i32
    %c0_i32_66 = arith.constant 0 : i32
    %164 = arith.cmpi ne, %163, %c0_i32_66 : i32
    scf.if %164 {
      %177 = arith.index_cast %161 : i32 to index
      %c0_76 = arith.constant 0 : index
      %178 = vector.load %arg3[%177, %c0_76] : memref<4x128xf32, #tpu.memory_space<vmem>>, vector<1x128xf32>
      %c0_77 = arith.constant 0 : index
      %c0_78 = arith.constant 0 : index
      %c0_79 = arith.constant 0 : index
      %179 = vector.load %arg5[%c0_77, %c0_78, %c0_79] : memref<1x16x128xf32, #tpu.memory_space<vmem>>, vector<1x1x128xf32>
      %180 = vector.shape_cast %179 : vector<1x1x128xf32> to vector<1x128xf32>
      %181 = vector.shape_cast %178 : vector<1x128xf32> to vector<1x1x128xf32>
      tpu.vector_store %arg5[%c0_77, %c0_78, %c0_79], %181 {strides = array<i32>} : memref<1x16x128xf32, #tpu.memory_space<vmem>>, vector<1x1x128xf32>,
    } else {
    }
    %c1_i32_67 = arith.constant 1 : i32
    %165 = arith.addi %0, %c1_i32_67 : i32
    %c4_i32_68 = arith.constant 4 : i32
    %166 = arith.cmpi slt, %165, %c4_i32_68 : i32
    %167 = arith.extui %166 : i1 to i32
    %c0_i32_69 = arith.constant 0 : i32
    %168 = arith.cmpi ne, %167, %c0_i32_69 : i32
    scf.if %168 {
      %177 = arith.index_cast %165 : i32 to index
      %c0_76 = arith.constant 0 : index
      %178 = vector.load %arg3[%177, %c0_76] : memref<4x128xf32, #tpu.memory_space<vmem>>, vector<1x128xf32>
      %c0_77 = arith.constant 0 : index
      %c1_78 = arith.constant 1 : index
      %c0_79 = arith.constant 0 : index
      %179 = vector.load %arg5[%c0_77, %c1_78, %c0_79] : memref<1x16x128xf32, #tpu.memory_space<vmem>>, vector<1x1x128xf32>
      %180 = vector.shape_cast %179 : vector<1x1x128xf32> to vector<1x128xf32>
      %181 = vector.shape_cast %178 : vector<1x128xf32> to vector<1x1x128xf32>
      tpu.vector_store %arg5[%c0_77, %c1_78, %c0_79], %181 {strides = array<i32>} : memref<1x16x128xf32, #tpu.memory_space<vmem>>, vector<1x1x128xf32>,
    } else {
    }
    %c2_i32_70 = arith.constant 2 : i32
    %169 = arith.addi %0, %c2_i32_70 : i32
    %c4_i32_71 = arith.constant 4 : i32
    %170 = arith.cmpi slt, %169, %c4_i32_71 : i32
    %171 = arith.extui %170 : i1 to i32
    %c0_i32_72 = arith.constant 0 : i32
    %172 = arith.cmpi ne, %171, %c0_i32_72 : i32
    scf.if %172 {
      %177 = arith.index_cast %169 : i32 to index
      %c0_76 = arith.constant 0 : index
      %178 = vector.load %arg3[%177, %c0_76] : memref<4x128xf32, #tpu.memory_space<vmem>>, vector<1x128xf32>
      %c0_77 = arith.constant 0 : index
      %c2_78 = arith.constant 2 : index
      %c0_79 = arith.constant 0 : index
      %179 = vector.load %arg5[%c0_77, %c2_78, %c0_79] : memref<1x16x128xf32, #tpu.memory_space<vmem>>, vector<1x1x128xf32>
      %180 = vector.shape_cast %179 : vector<1x1x128xf32> to vector<1x128xf32>
      %181 = vector.shape_cast %178 : vector<1x128xf32> to vector<1x1x128xf32>
      tpu.vector_store %arg5[%c0_77, %c2_78, %c0_79], %181 {strides = array<i32>} : memref<1x16x128xf32, #tpu.memory_space<vmem>>, vector<1x1x128xf32>,
    } else {
    }
    %c3_i32_73 = arith.constant 3 : i32
    %173 = arith.addi %0, %c3_i32_73 : i32
    %c4_i32_74 = arith.constant 4 : i32
    %174 = arith.cmpi slt, %173, %c4_i32_74 : i32
    %175 = arith.extui %174 : i1 to i32
    %c0_i32_75 = arith.constant 0 : i32
    %176 = arith.cmpi ne, %175, %c0_i32_75 : i32
    scf.if %176 {
      %177 = arith.index_cast %173 : i32 to index
      %c0_76 = arith.constant 0 : index
      %178 = vector.load %arg3[%177, %c0_76] : memref<4x128xf32, #tpu.memory_space<vmem>>, vector<1x128xf32>
      %c0_77 = arith.constant 0 : index
      %c3_78 = arith.constant 3 : index
      %c0_79 = arith.constant 0 : index
      %179 = vector.load %arg5[%c0_77, %c3_78, %c0_79] : memref<1x16x128xf32, #tpu.memory_space<vmem>>, vector<1x1x128xf32>
      %180 = vector.shape_cast %179 : vector<1x1x128xf32> to vector<1x128xf32>
      %181 = vector.shape_cast %178 : vector<1x128xf32> to vector<1x1x128xf32>
      tpu.vector_store %arg5[%c0_77, %c3_78, %c0_79], %181 {strides = array<i32>} : memref<1x16x128xf32, #tpu.memory_space<vmem>>, vector<1x1x128xf32>,
    } else {
    }
    return
  }
  func.func @transform_0(%arg0: i32, %arg1: i32, %arg2: memref<32xi32, #tpu.memory_space<smem>>) -> (i32, i32) {
    %c0_i32 = arith.constant 0 : i32
    %c0_i32_0 = arith.constant 0 : i32
    %c0_i32_1 = arith.constant 0 : i32
    return %c0_i32, %c0_i32_0 : i32, i32
  }
  func.func @transform_1(%arg0: i32, %arg1: i32, %arg2: memref<32xi32, #tpu.memory_space<smem>>) -> (i32, i32) {
    %c0_i32 = arith.constant 0 : i32
    %c0_i32_0 = arith.constant 0 : i32
    %c0_i32_1 = arith.constant 0 : i32
    return %c0_i32, %c0_i32_0 : i32, i32
  }
  func.func @transform_2(%arg0: i32, %arg1: i32, %arg2: memref<32xi32, #tpu.memory_space<smem>>) -> (i32, i32, i32) {
    %c0_i32 = arith.constant 0 : i32
    %c0_i32_0 = arith.constant 0 : i32
    return %arg0, %arg1, %c0_i32 : i32, i32, i32
  }
}

</mosaic_0001>

<bundles_post_ra>
// kernel: tpu_custom_call.1
= control target key start
LH: loop header
LB: loop body
LE: loop exit
PB: predicated region body
PF: predicated region fallthrough
CT: control target
= control target key end

     0   :  { %s681_s15 = smov [#allocation3]   ;;  %s877_s0 = inlined_call_operand.hbm [shape: s32[32], index: 0, kind: input, shape index: {}]   ;;  %s878_s1 = inlined_call_operand.hbm [shape: f32[4,128], index: 1, kind: input, shape index: {}]   ;;  %s879_s2 = inlined_call_operand.hbm [shape: f32[32,128], index: 2, kind: input, shape index: {}]   ;;  %s880_s3 = inlined_call_operand.hbm [shape: f32[2,16,128], index: 3, kind: output, shape index: {}]  }
   0x1   :  { %s9_s14 = sshll.u32 %s877_s0, 4  ;;  %s10_s14 = int_to_ptr.hbm [resolvable:$true] %s9_s14 }
   0x2   :  { %12 = dma.hbm_to_smem %s10_s14, 16, %s681_s15, [#allocation2] }
   0x3   :  { %643 = dma.done.wait [#allocation2], 16 }
   0x4   :  { %644 = vsyncadd [#allocation2], 4294967280 }
   0x5   :  { %15 = sfence }
   0x6   :  { %16 = vsyncpa [#allocation5], 0 }
   0x7   :  { %17 = vsyncpa [#allocation8], 0 }
   0x8   :  { %18 = vsyncpa [#allocation6], 0 }
   0x9   :  { %20 = vsyncpa [#allocation6 + $0x1], 0  ;;  %s711_s16 = smov 0   ;;  %s713_s17 = smov 0  }
   0xa   :  { %s715_s18 = smov 0   ;;  %s717_s19 = smov 0  }
   0xb   :  { %s719_s20 = smov 0   ;;  %s721_s0 = smov 0  }
   0xc LB: > { %s419_s21 = sadd.s32 4294967295, %s679_s0   ;;  %s420_s22 = sadd.s32 4294967294, %s679_s0   ;;  %s679_s0 = sphi %s721_s0, %s26_s0   ;;  %s675_s20 = sphi %s719_s20, %s891_s20   ;;  %s671_s19 = sphi %s717_s19, %s890_s19   ;;  %s667_s18 = sphi %s715_s18, %s889_s18   ;;  %s663_s17 = sphi %s713_s17, %s888_s17   ;;  %s659_s16 = sphi %s711_s16, %s887_s16  }
   0xd   : > { %s38_s23 = sadd.s32 1, %s675_s20  ;;  %s89_s24 = sadd.s32 1, %s667_s18 }
   0xe   : > { %p40_p0 = scmp.ge.s32.totalorder %s38_s23, 2  ;;  %p99_p1 = scmp.ne.s32.totalorder %s667_s18, %s663_s17 }
   0xf   : > { %p100_p2 = scmp.eq.s32.totalorder %s419_s21, 1  ;;  %p105_p3 = scmp.ne.s32.totalorder %s663_s17, %s659_s16 }
  0x10   : > { %s893_s23 = smov (%p40_p0, %s38_s23), 0  ;;  %p106_p5 = scmp.eq.s32.totalorder %s420_s22, 1 }
  0x11   : > { %p751_p4 = por %p100_p2, %p99_p1  ;;  %s84_s26 = ssub.s32 %s675_s20, %s893_s23 }
  0x12   : > { %p421_p6 = scmp.ge.s32.totalorder %s679_s0, 1  ;;  %p87_p7 = scmp.eq.s32.totalorder %s84_s26, 0 }
  0x13   : > { %p758_p8 = por %p106_p5, %p105_p3  ;;  %p113_p9 = scmp.lt.s32.totalorder %s679_s0, 3 }
  0x14   : > { %s764_s28 = scalar_select %p87_p7, %s667_s18, %s89_s24  }
  0x15   : > { %p766_p10 = pnand %p421_p6, %p113_p9  ;;  %p770_p11 = scmp.eq.s32.totalorder %s419_s21, 0 }
  0x16   : > { %s125_s6 = sshll.u32 %s878_s1, 4  ;;  %s682_s7 = smov [#allocation4]   ;;  %s126_s6 = int_to_ptr.hbm [resolvable:$true] %s125_s6 }
  0x17   : > { %p448_p12 = pneg %p766_p10  ;;  %s127_s8 = sshll.u32 %s682_s7, 4  ;;  %s128_s8 = int_to_ptr.vmem [resolvable:$true] %s127_s8 }
  0x18   : > { %s136_s11 = sshll.u32 %s879_s2, 4  ;;  %s683_s12 = smov [#allocation7]   ;;  %s137_s11 = int_to_ptr.hbm [resolvable:$true] %s136_s11 }
  0x19   : > { %p449_p13 = pnand %p770_p11, %p448_p12  ;;  %s138_s13 = sshll.u32 %s683_s12, 4  ;;  %s139_s13 = int_to_ptr.vmem [resolvable:$true] %s138_s13 }
  0x1a   : > { %s684_s14 = smov 128   ;;  %s685_s15 = smov 8  }
  0x1b   : > { %451 = dma.hbm_to_vmem [thread:$0]  (!%p449_p13), %s126_s6, 64, %s128_s8, [#allocation5]  }
  0x1c   : > { %454 = dma.hbm_to_vmem [thread:$0]  (!%p449_p13), %s137_s11, 512, %s139_s13, [#allocation8], %s684_s14, %s684_s14, %s685_s15  }
  0x1d   : > { %154 = sbr.rel (%p766_p10) target bundleno = 77 (0x4d), region = 28 }
  0x22   : > { %646 = dma.done.wait (%p770_p11), [#allocation5], 64  }
  0x23   : > { %648 = vsyncadd (%p770_p11), [#allocation5], 4294967232 }
  0x24   : > { %650 = dma.done.wait (%p770_p11), [#allocation8], 512  }
  0x25   : > { %652 = vsyncadd (%p770_p11), [#allocation8], 4294966784  ;;  %s881_s21 = sand.u32 1, %s663_s17   ;;  %s796_s22 = sshll.u32 %s671_s19, 4  ;;  %v265_v5 = vld [vmem:[#allocation4] sm:$0xf]  }
  0x26   : > { %s427_s24 = sshll.u32 %s881_s21, 4  ;;  %s181_s26 = sld [smem:[#allocation3 + %s796_s22]] }
  0x27   : > { %s185_s29 = sadd.s32 1, %s796_s22  ;;  %s190_s30 = sadd.s32 2, %s796_s22 }
  0x28   : > { %s186_s4 = sld [smem:[#allocation3 + %s185_s29]]  ;;  %s195_s5 = sadd.s32 3, %s796_s22 }
  0x29   : > { %s191_s6 = sld [smem:[#allocation3 + %s190_s30]]  ;;  %s200_s7 = sadd.s32 4, %s796_s22 }
  0x2a   : > { %s196_s19 = sld [smem:[#allocation3 + %s195_s5]]  ;;  %s205_s8 = sadd.s32 5, %s796_s22 }
  0x2b   : > { %s201_s9 = sld [smem:[#allocation3 + %s200_s7]]  ;;  %s210_s12 = sadd.s32 6, %s796_s22 }
  0x2c   : > { %s182_s10 = scalar_lea.vmem [#allocation7], %s181_s26  ;;  %s206_s11 = sld [smem:[#allocation3 + %s205_s8]] }
  0x2d   : > { %v183_v0 = vld [vmem:[%s182_s10] sm:$0x1]  ;;  %s807_s13 = scalar_lea.vmem [#allocation9], %s427_s24  ;;  %s211_s14 = sld [smem:[#allocation3 + %s210_s12]] }
  0x2e   : > { %184 = vst [vmem:[%s807_s13] sm:$0x1] %v183_v0  ;;  %s215_s15 = sadd.s32 7, %s796_s22  ;;  %s187_s30 = scalar_lea.vmem [#allocation7], %s186_s4 }
  0x2f   : > { %s216_s29 = sld [smem:[#allocation3 + %s215_s15]]  ;;  %v188_v1 = vld [vmem:[%s187_s30] sm:$0x1]  ;;  %s220_s5 = sadd.s32 8, %s796_s22 }
  0x30   : > { %189 = vst [vmem:[%s807_s13 + $0x1] sm:$0x1] %v188_v1  ;;  %s192_s26 = scalar_lea.vmem [#allocation7], %s191_s6  ;;  %s221_s7 = sld [smem:[#allocation3 + %s220_s5]] }
  0x31   : > { %v193_v2 = vld [vmem:[%s192_s26] sm:$0x1]  ;;  %s197_s24 = scalar_lea.vmem [#allocation7], %s196_s19  ;;  %s225_s8 = sadd.s32 9, %s796_s22 }
  0x32   : > { %194 = vst [vmem:[%s807_s13 + $0x2] sm:$0x1] %v193_v2  ;;  %v198_v3 = vld [vmem:[%s197_s24] sm:$0x1]  ;;  %s202_s10 = scalar_lea.vmem [#allocation7], %s201_s9  ;;  %s226_s4 = sld [smem:[#allocation3 + %s225_s8]] }
  0x33   : > { %199 = vst [vmem:[%s807_s13 + $0x3] sm:$0x1] %v198_v3  ;;  %v203_v4 = vld [vmem:[%s202_s10] sm:$0x1]  ;;  %s207_s12 = scalar_lea.vmem [#allocation7], %s206_s11  ;;  %s230_s6 = sadd.s32 10, %s796_s22 }
  0x34   : > { %204 = vst [vmem:[%s807_s13 + $0x4] sm:$0x1] %v203_v4  ;;  %v208_v6 = vld [vmem:[%s207_s12] sm:$0x1]  ;;  %s212_s19 = scalar_lea.vmem [#allocation7], %s211_s14  ;;  %s231_s15 = sld [smem:[#allocation3 + %s230_s6]] }
  0x35   : > { %209 = vst [vmem:[%s807_s13 + $0x5] sm:$0x1] %v208_v6  ;;  %v213_v7 = vld [vmem:[%s212_s19] sm:$0x1]  ;;  %s217_s30 = scalar_lea.vmem [#allocation7], %s216_s29  ;;  %s235_s9 = sadd.s32 11, %s796_s22 }
  0x36   : > { %214 = vst [vmem:[%s807_s13 + $0x6] sm:$0x1] %v213_v7  ;;  %v218_v8 = vld [vmem:[%s217_s30] sm:$0x1]  ;;  %s240_s5 = sadd.s32 12, %s796_s22  ;;  %s236_s26 = sld [smem:[#allocation3 + %s235_s9]] }
  0x37   : > { %219 = vst [vmem:[%s807_s13 + $0x7] sm:$0x1] %v218_v8  ;;  %s222_s11 = scalar_lea.vmem [#allocation7], %s221_s7  ;;  %s241_s24 = sld [smem:[#allocation3 + %s240_s5]] }
  0x38   : > { %v223_v9 = vld [vmem:[%s222_s11] sm:$0x1]  ;;  %s245_s8 = sadd.s32 13, %s796_s22  ;;  %266 = vst [vmem:[%s807_s13] sm:$0xf] %v265_v5   ;;  %s227_s10 = scalar_lea.vmem [#allocation7], %s226_s4 }
  0x39   : > { %224 = vst [vmem:[%s807_s13 + $0x8] sm:$0x1] %v223_v9  ;;  %s246_s14 = sld [smem:[#allocation3 + %s245_s8]]  ;;  %v228_v10 = vld [vmem:[%s227_s10] sm:$0x1]  ;;  %s250_s29 = sadd.s32 14, %s796_s22 }
  0x3a   : > { %s255_s12 = sadd.s32 15, %s796_s22  ;;  %229 = vst [vmem:[%s807_s13 + $0x9] sm:$0x1] %v228_v10  ;;  %s251_s6 = sld [smem:[#allocation3 + %s250_s29]] }
  0x3b   : > { %s232_s19 = scalar_lea.vmem [#allocation7], %s231_s15  ;;  %s256_s7 = sld [smem:[#allocation3 + %s255_s12]] }
  0x3c   : > { %v233_v11 = vld [vmem:[%s232_s19] sm:$0x1]  ;;  %s305_s5 = scalar_lea.hbm %s880_s3, %s796_s22  ;;  %s306_s11 = sshll.u32 %s807_s13, 4  ;;  %s307_s11 = int_to_ptr.vmem [resolvable:$true] %s306_s11 }
  0x3d   : > { %234 = vst [vmem:[%s807_s13 + $0xa] sm:$0x1] %v233_v11  ;;  %s237_s21 = scalar_lea.vmem [#allocation7], %s236_s26  ;;  %s242_s4 = scalar_lea.vmem [#allocation7], %s241_s24 }
  0x3e   : > { %v238_v12 = vld [vmem:[%s237_s21] sm:$0x1]  ;;  %s836_s8 = sshll.u32 %s305_s5, 4  ;;  %s886_s21 = sand.u32 1, %s663_s17   ;;  %s309_s8 = int_to_ptr.hbm [resolvable:$true] %s836_s8 }
  0x3f   : > { %239 = vst [vmem:[%s807_s13 + $0xb] sm:$0x1] %v238_v12  ;;  %v243_v13 = vld [vmem:[%s242_s4] sm:$0x1]  ;;  %s247_s15 = scalar_lea.vmem [#allocation7], %s246_s14  ;;  %s292_s10 = scalar_lea.sflag [#allocation6], %s886_s21 }
  0x40   : > { %244 = vst [vmem:[%s807_s13 + $0xc] sm:$0x1] %v243_v13  ;;  %v248_v14 = vld [vmem:[%s247_s15] sm:$0x1]  ;;  %s252_s22 = scalar_lea.vmem [#allocation7], %s251_s6  ;;  %s605_s24 = sshra.s32 %s309_s8, 4  ;;  %s606_s24 = int_to_ptr.hbm [resolvable:$true] %s605_s24 }
  0x41   : > { %249 = vst [vmem:[%s807_s13 + $0xd] sm:$0x1] %v248_v14  ;;  %v253_v15 = vld [vmem:[%s252_s22] sm:$0x1]  ;;  %s257_s26 = scalar_lea.vmem [#allocation7], %s256_s7  ;;  %s607_s29 = scalar_lea.hbm %s606_s24, 16 }
  0x42   : > { %254 = vst [vmem:[%s807_s13 + $0xe] sm:$0x1] %v253_v15  ;;  %v258_v16 = vld [vmem:[%s257_s26] sm:$0x1]  ;;  %p608_p0 = scmp.ne.s32.totalorder %s606_s24, %s607_s29  ;;  %s611_s19 = scalar_lea.hbm %s880_s3, 32 }
  0x43   : > { %259 = vst [vmem:[%s807_s13 + $0xf] sm:$0x1] %v258_v16  ;;  %p612_p3 = scmp.lt.s32.totalorder %s606_s24, %s880_s3  ;;  %p613_p5 = scmp.lt.s32.totalorder %s611_s19, %s607_s29 }
  0x44   : > { %p609_p1 = pnand %p608_p0, %p751_p4 }
  0x45   : > { %p614_p6 = por %p613_p5, %p612_p3 }
  0x46   : > { %p610_p2 = pneg %p609_p1 }
  0x48   : > { %p615_p7 = pnand %p614_p6, %p610_p2 }
  0x4a   : > { %618 = shalt.err (!%p615_p7)
}
  0x4b   : > { %s686_s13 = smov 128   ;;  %s687_s7 = smov 8  }
  0x4c   : > { %446 = dma.vmem_to_hbm [thread:$0]  (%p751_p4), %s307_s11, 256, %s309_s8, %s292_s10, %s686_s13, %s686_s13, %s687_s7  }
  0x4d PF: > { %p463_p9 = scmp.ge.s32.totalorder %s679_s0, 2  ;;  %s323_s9 = sand.u32 1, %s659_s16  }
  0x4e   : > { %s324_s5 = scalar_lea.sflag [#allocation6], %s323_s9 }
  0x4f   : > { %p456_p10 = pnand %p463_p9, %p758_p8 }
  0x51   : > { %p457_p11 = pneg %p456_p10 }
  0x53   : > { %654 = dma.done.wait (%p457_p11), %s324_s5, 256  }
  0x54   : > { %656 = vsyncadd (%p457_p11), %s324_s5, 4294967040  ;;  %s26_s0 = sadd.s32 1, %s679_s0   ;;  %s887_s16 = smov %s663_s17 }
  0x55   : > { %p23_p12 = scmp.ge.s32.totalorder %s26_s0, 4   ;;  %s888_s17 = smov %s667_s18 }
  0x56   : > { %s889_s18 = smov %s764_s28  ;;  %s890_s19 = smov %s675_s20 }
  0x57   : > { %s891_s20 = smov %s893_s23  ;;  %25 = sbr.rel (!%p23_p12) target bundleno = 12 (0xc), region = 105 }
  0x5c   :  { %330 = vsyncpa [#allocation5], 1 }
  0x5d   :  { %332 = vsyncpa [#allocation5 + $0x1], 1 }
  0x5e   :  { %333 = vsyncpa [#allocation8], 1 }
  0x5f   :  { %334 = vsyncpa [#allocation6], 1 }
  0x60   :  { %336 = vsyncpa [#allocation6 + $0x1], 1 }

</bundles_post_ra>
